<compile_context>
chip_gen: v7x
topology: tpu7x:2x2x1
jax: 0.10.0
libtpu: 0.0.40
codegen_flags: <defaults>
</compile_context>

<pallas_src>
import jax
import jax.numpy as jnp
from jax.experimental import pallas as pl
from jax.experimental.pallas import tpu as pltpu

_LANE = 128
_MIN_BLOCK_BYTES = 1 << 20   # ~roofline knee: >=1 MiB blocks reach ~85% of HBM BW


def _cdiv(a, b):
    return -(-a // b)


def _round_up(a, b):
    return _cdiv(a, b) * b


def _largest_divisor_leq(n, cap):
    """Largest divisor of n that is <= cap (always >= 1)."""
    cap = max(1, min(n, cap))
    best = 1
    i = 1
    while i * i <= n:
        if n % i == 0:
            for d in (i, n // i):
                if d <= cap and d > best:
                    best = d
        i += 1
    return best


def _generation_params():
    """(per-block byte target, #TensorCores sharing the grid) per TPU gen."""
    kind = ""
    try:
        kind = jax.devices()[0].device_kind.lower()
    except Exception:
        pass
    if "v7" in kind or "7x" in kind:
        # v7x: ~3.2 TB/s HBM per TC -> larger blocks; 2 TCs share the grid.
        return 8 << 20, 2
    if "v5 lite" in kind or "v5lite" in kind or "v5e" in kind:
        # v5e: 16 MiB scoped-VMEM default -> keep 2x(in+out) well under it.
        return 2 << 20, 1
    if "v4" in kind or "v5p" in kind:
        return 4 << 20, 2
    # v6e / unknown: 4 MiB blocks already sit at the roofline plateau.
    return 4 << 20, 1


def _vmem_limit(block_bytes):
    # Double-buffered input + output blocks, plus slack for the tiny
    # scale/offset tiles and internal scratch.  Always <= ~36 MiB, i.e. well
    # under v7x's 64 MiB physical per-TC VMEM.
    return max(16 << 20, 4 * block_bytes + (4 << 20))


def _affine_kernel(so_ref, x_ref, o_ref):
    # so_ref: (tr, 2) f32 — column 0 = std (scale), column 1 = mean (offset).
    # x_ref / o_ref: (tr, ts) lane-dense data tiles.
    scale = so_ref[:, 0:1]
    offset = so_ref[:, 1:2]
    o_ref[...] = (x_ref[...] * scale + offset).astype(o_ref.dtype)


def _affine_rowwise_kernel(so_ref, x_ref, o_ref):
    # so_ref: (2, R) f32 in SMEM (row 0 = std, row 1 = mean).
    # x_ref / o_ref: (t1, 128) block of one (batch, channel) row.
    r = pl.program_id(0)
    o_ref[...] = (x_ref[...] * so_ref[0, r] + so_ref[1, r]).astype(o_ref.dtype)


def _run_tiled(x2, scale_row, offset_row, R, S, sublane, target_elems, itemsize):
    """Main path (R % sublane == 0): (tr, ts) blocks over an (R, S_pad) view."""
    ts_budget_lanes = max(1, target_elems // (sublane * _LANE))
    if S % _LANE == 0:
        s_pad = S
        ts = _LANE * _largest_divisor_leq(S // _LANE, ts_budget_lanes)
    else:
        # Choose the block width first, then pad S to a whole number of
        # blocks: bounded block bytes, padding at most one block per row.
        s_lanes = _cdiv(S, _LANE)
        n_s = _cdiv(s_lanes, ts_budget_lanes)
        ts = _LANE * _cdiv(s_lanes, n_s)
        s_pad = n_s * ts
        x2 = jnp.pad(x2, ((0, 0), (0, s_pad - S)))
    tr_budget = max(1, (target_elems // ts) // sublane)
    tr = sublane * _largest_divisor_leq(R // sublane, tr_budget)

    so = jnp.stack([scale_row, offset_row], axis=-1)       # (R, 2) f32
    grid = (R // tr, s_pad // ts)   # s trails: (tr,2) block fetched once per r

    out2 = pl.pallas_call(
        _affine_kernel,
        out_shape=jax.ShapeDtypeStruct((R, s_pad), x2.dtype),
        grid=grid,
        in_specs=[
            pl.BlockSpec((tr, 2), lambda r, s: (r, 0)),     # packed [std, mean]
            pl.BlockSpec((tr, ts), lambda r, s: (r, s)),    # image block
        ],
        out_specs=pl.BlockSpec((tr, ts), lambda r, s: (r, s)),
        compiler_params=pltpu.CompilerParams(
            dimension_semantics=("parallel", "parallel"),
            vmem_limit_bytes=_vmem_limit(tr * ts * itemsize),
        ),
    )(so, x2)
    return out2[:, :S] if s_pad != S else out2


def _run_rowwise(x2, scale_row, offset_row, R, S, sublane, target_elems, itemsize):
    """Fallback (R % sublane != 0, e.g. N=1,C=3): one grid row per channel row,
    its H*W reshaped to sublane x 128 dense (t1, 128) blocks; per-row scale and
    offset read as scalars from SMEM (no sub-sublane blocks / masked stores)."""
    t1_target = max(sublane, ((target_elems // _LANE) // sublane) * sublane)
    s_lanes = _cdiv(S, _LANE)
    n_s = _cdiv(s_lanes, t1_target)
    t1 = _round_up(_cdiv(s_lanes, n_s), sublane)
    s1 = n_s * t1
    s_pad = s1 * _LANE
    if s_pad != S:
        x2 = jnp.pad(x2, ((0, 0), (0, s_pad - S)))
    x3 = x2.reshape(R, s1, _LANE)

    so = jnp.stack([scale_row, offset_row], axis=0)         # (2, R) f32 (long axis last)
    grid = (R, n_s)

    out3 = pl.pallas_call(
        _affine_rowwise_kernel,
        out_shape=jax.ShapeDtypeStruct((R, s1, _LANE), x2.dtype),
        grid=grid,
        in_specs=[
            pl.BlockSpec(memory_space=pltpu.MemorySpace.SMEM),         # scalars
            pl.BlockSpec((None, t1, _LANE), lambda r, s: (r, s, 0)),   # row block
        ],
        out_specs=pl.BlockSpec((None, t1, _LANE), lambda r, s: (r, s, 0)),
        compiler_params=pltpu.CompilerParams(
            dimension_semantics=("parallel", "parallel"),
            vmem_limit_bytes=_vmem_limit(t1 * _LANE * itemsize),
        ),
    )(so, x3)
    out2 = out3.reshape(R, s_pad)
    return out2[:, :S] if s_pad != S else out2


def unnormalize(image, mean, std):
    """image: (N, C, H, W) float; mean, std: (C,). Returns image*std[c] + mean[c]."""
    N, C, H, W = image.shape   # the PyTorch module's forward only supports 4D NCHW
    dtype = image.dtype
    itemsize = jnp.dtype(dtype).itemsize
    sublane = {4: 8, 2: 16, 1: 32}.get(itemsize, 8)

    R = N * C          # merged batch*channel rows (row r -> channel r % C)
    S = H * W          # flattened, lane-dense spatial axis

    # Per-row std/mean kept in f32: FMA in f32, cast to image dtype on store.
    scale_row = jnp.tile(jnp.asarray(std, jnp.float32).reshape(-1), N)    # (R,)
    offset_row = jnp.tile(jnp.asarray(mean, jnp.float32).reshape(-1), N)  # (R,)

    x2 = image.reshape(R, S)

    block_bytes, num_cores = _generation_params()
    total_bytes = R * S * itemsize
    if num_cores >= 2 and total_bytes >= 2 * _MIN_BLOCK_BYTES:
        # Guarantee >= 2 blocks so both TensorCores get work, without dropping
        # below the ~1 MiB roofline knee.
        block_bytes = min(block_bytes, total_bytes // 2)
    target_elems = max(block_bytes // itemsize, sublane * _LANE)

    if R % sublane == 0:
        out2 = _run_tiled(x2, scale_row, offset_row, R, S, sublane, target_elems, itemsize)
    else:
        out2 = _run_rowwise(x2, scale_row, offset_row, R, S, sublane, target_elems, itemsize)

    return out2.reshape(N, C, H, W)


if __name__ == "__main__":
    key = jax.random.PRNGKey(0)

    def _ref(x, mean, std):
        y = x.astype(jnp.float32) * std[None, :, None, None] + mean[None, :, None, None]
        return y.astype(x.dtype)

    # Case 1: main tiled path (R % sublane == 0, S % 128 == 0).
    N, C, H, W = 2, 4, 16, 16
    x = jax.random.normal(key, (N, C, H, W), dtype=jnp.float32)
    mean = jnp.array([0.485, 0.456, 0.406, 0.5], dtype=jnp.float32)
    std = jnp.array([0.229, 0.224, 0.225, 0.25], dtype=jnp.float32)
    out = jax.block_until_ready(unnormalize(x, mean, std))
    assert out.shape == (N, C, H, W)
    assert jnp.allclose(out, _ref(x, mean, std), atol=1e-6, rtol=1e-6)

    # Case 2: row-wise fallback (N=1, C=3 RGB, non-128-divisible H*W).
    x3 = jax.random.normal(jax.random.PRNGKey(1), (1, 3, 7, 7), dtype=jnp.float32)
    mean3 = jnp.array([0.485, 0.456, 0.406], dtype=jnp.float32)
    std3 = jnp.array([0.229, 0.224, 0.225], dtype=jnp.float32)
    out3 = jax.block_until_ready(unnormalize(x3, mean3, std3))
    assert jnp.allclose(out3, _ref(x3, mean3, std3), atol=1e-6, rtol=1e-6)

    # Case 3: bf16 input (dtype-aware sublane; f32 compute, cast on store).
    xb = jax.random.normal(jax.random.PRNGKey(2), (2, 4, 16, 16), dtype=jnp.bfloat16)
    outb = jax.block_until_ready(unnormalize(xb, mean, std))
    assert jnp.allclose(outb.astype(jnp.float32),
                        _ref(xb, mean, std).astype(jnp.float32),
                        atol=2e-2, rtol=2e-2)

    print("KERNEL_OK")
</pallas_src>

<mosaic_0001>
module attributes {stable_mosaic.version = 11 : i64} {
  func.func @_affine_kernel(%arg0: i32, %arg1: i32, %arg2: memref<8x2xf32, #tpu.memory_space<vmem>>, %arg3: memref<8x256xf32, #tpu.memory_space<vmem>>, %arg4: memref<8x256xf32, #tpu.memory_space<vmem>>) attributes {dimension_semantics = [#tpu.dimension_semantics<parallel>, #tpu.dimension_semantics<parallel>], iteration_bounds = array<i64: 1, 1>, scalar_prefetch = 0 : i64, scratch_operands = 0 : i64, tpu.core_type = #tpu.core_type<tc>, window_params = [{transform_indices = @transform_0, window_bounds = array<i64: 8, 2>}, {transform_indices = @transform_1, window_bounds = array<i64: 8, 256>}, {transform_indices = @transform_2, window_bounds = array<i64: 8, 256>}]} {
    %c0 = arith.constant 0 : index
    %c0_0 = arith.constant 0 : index
    %0 = vector.load %arg2[%c0, %c0_0] : memref<8x2xf32, #tpu.memory_space<vmem>>, vector<8x1xf32>
    %c0_1 = arith.constant 0 : index
    %c1 = arith.constant 1 : index
    %1 = vector.load %arg2[%c0_1, %c1] : memref<8x2xf32, #tpu.memory_space<vmem>>, vector<8x1xf32>
    %c0_2 = arith.constant 0 : index
    %c0_3 = arith.constant 0 : index
    %2 = vector.load %arg3[%c0_2, %c0_3] : memref<8x256xf32, #tpu.memory_space<vmem>>, vector<8x256xf32>
    %3 = vector.broadcast %0 : vector<8x1xf32> to vector<8x256xf32>
    %4 = arith.mulf %2, %3 : vector<8x256xf32>
    %5 = vector.broadcast %1 : vector<8x1xf32> to vector<8x256xf32>
    %6 = arith.addf %4, %5 : vector<8x256xf32>
    %c0_4 = arith.constant 0 : index
    %c0_5 = arith.constant 0 : index
    %7 = vector.load %arg4[%c0_4, %c0_5] : memref<8x256xf32, #tpu.memory_space<vmem>>, vector<8x256xf32>
    tpu.vector_store %arg4[%c0_4, %c0_5], %6 {strides = array<i32>} : memref<8x256xf32, #tpu.memory_space<vmem>>, vector<8x256xf32>,
    return
  }
  func.func @transform_0(%arg0: i32, %arg1: i32) -> (i32, i32) {
    %c0_i32 = arith.constant 0 : i32
    %c0_i32_0 = arith.constant 0 : i32
    return %arg0, %c0_i32 : i32, i32
  }
  func.func @transform_1(%arg0: i32, %arg1: i32) -> (i32, i32) {
    %c0_i32 = arith.constant 0 : i32
    return %arg0, %arg1 : i32, i32
  }
  func.func @transform_2(%arg0: i32, %arg1: i32) -> (i32, i32) {
    %c0_i32 = arith.constant 0 : i32
    return %arg0, %arg1 : i32, i32
  }
}

</mosaic_0001>

<bundles_post_ra>
// kernel: tpu_custom_call.1
= control target key start
LH: loop header
LB: loop body
LE: loop exit
PB: predicated region body
PF: predicated region fallthrough
CT: control target
= control target key end

     0   :  { %7 = vsyncpa [#allocation3], 0  ;;  %s157_s0 = inlined_call_operand.vmem [shape: f32[8,2], index: 0, kind: input, shape index: {}]   ;;  %s158_s1 = inlined_call_operand.hbm [shape: f32[8,256], index: 1, kind: input, shape index: {}]   ;;  %s159_s2 = inlined_call_operand.hbm [shape: f32[8,256], index: 2, kind: output, shape index: {}]  }
   0x1   :  { %8 = vsyncpa [#allocation4], 0  ;;  %s111_s9 = smov [#allocation2]   ;;  %s63_s13 = scalar_lea.hbm %s158_s1, 256 }
   0x2   :  { %s17_s10 = sshll.u32 %s111_s9, 4  ;;  %p64_p0 = scmp.ne.s32.totalorder %s158_s1, %s63_s13  ;;  %s18_s10 = int_to_ptr.vmem [resolvable:$true] %s17_s10 }
   0x3   :  { %p67_p1 = scmp.lt.u32.totalorder %s63_s13, %s158_s1 }
   0x5   :  { %p69_p2 = pnand %p67_p1, %p64_p0 }
   0x7   :  { %72 = shalt.err (!%p69_p2)
}
   0x8   :  { %s73_s18 = scalar_lea.vmem %s18_s10, 256  ;;  %p78_p4 = scmp.lt.s32.totalorder %s18_s10, %s18_s10 }
   0x9   :  { %p74_p3 = scmp.ne.s32.totalorder %s18_s10, %s73_s18  ;;  %p79_p5 = scmp.lt.s32.totalorder %s73_s18, %s73_s18 }
   0xb   :  { %p80_p6 = por %p79_p5, %p78_p4 }
   0xd   :  { %p81_p7 = pnand %p80_p6, %p74_p3 }
   0xf   :  { %84 = shalt.err (!%p81_p7)
}
  0x10   :  { %20 = dma.hbm_to_vmem [thread:$0]  %s158_s1, 256, %s18_s10, [#allocation3]  }
  0x11   :  { %107 = dma.done.wait [#allocation3], 256  }
  0x12   :  { %108 = vsyncadd [#allocation3], 4294967040  ;;  %v112_v0 = vmov 0   ;;  %v24_v1 = vld [vmem:[%s157_s0] sm:$0xff]  ;;  %v113_v2 = vmov 1   ;;  %v26_v5 = vld [vmem:[#allocation2 + $0x8] sm:$0xff] }
  0x13   :  { %61 = vset.pattern.permute.xlu0 %v112_v0  ;;  %v25_v4 = vld [vmem:[#allocation2] sm:$0xff]  ;;  %s114_s23 = smov [#allocation5]  }
  0x14   :  { %29 = vperm.xlu0 %61, %v24_v1   ;;  %s48_s24 = sshll.u32 %s114_s23, 4  ;;  %s49_s24 = int_to_ptr.vmem [resolvable:$true] %s48_s24 }
  0x15   :  { %s85_s1 = scalar_lea.vmem %s49_s24, 256  ;;  %p90_p9 = scmp.lt.s32.totalorder %s49_s24, %s49_s24 }
  0x16   :  { %p86_p8 = scmp.ne.s32.totalorder %s49_s24, %s85_s1  ;;  %p91_p10 = scmp.lt.s32.totalorder %s85_s1, %s85_s1 }
  0x18   :  { %62 = vset.pattern.permute.xlu0 %v113_v2  ;;  %p92_p11 = por %p91_p10, %p90_p9 }
  0x19   :  { %35 = vperm.xlu0 %62, %v24_v1  }
  0x1a   :  { %p93_p12 = pnand %p92_p11, %p86_p8 }
  0x93   :  { %v30_v3 = vpop.permute.xlu0 %29 }
  0x94   :  { %v32_v6 = vmul.f32 %v30_v3, %v25_v4  ;;  %v33_v7 = vmul.f32 %v30_v3, %v26_v5 }
  0x98   :  { %v36_v8 = vpop.permute.xlu0 %35 }
  0x99   :  { %v38_v9 = vadd.f32 %v36_v8, %v32_v6  ;;  %v39_v10 = vadd.f32 %v36_v8, %v33_v7 }
  0x9b   :  { %40 = vst [vmem:[#allocation5] sm:$0xff] %v38_v9  ;;  %41 = vst [vmem:[#allocation5 + $0x8] sm:$0xff] %v39_v10 }
  0x9c   :  { %96 = shalt.err (!%p93_p12)
}
  0x9d   :  { %s97_s26 = scalar_lea.hbm %s159_s2, 256 }
  0x9e   :  { %p98_p13 = scmp.ne.s32.totalorder %s159_s2, %s97_s26  ;;  %p101_p0 = scmp.lt.u32.totalorder %s97_s26, %s159_s2 }
  0xa0   :  { %p103_p1 = pnand %p101_p0, %p98_p13 }
  0xa2   :  { %106 = shalt.err (!%p103_p1)
}
  0xa3   :  { %51 = dma.vmem_to_hbm [thread:$0]  %s49_s24, 256, %s159_s2, [#allocation4]  }
  0xa4   :  { %109 = dma.done.wait [#allocation4], 256  }
  0xa5   :  { %110 = vsyncadd [#allocation4], 4294967040 }
  0xa6   :  { %55 = vsyncpa [#allocation3], 1 }
  0xa7   :  { %56 = vsyncpa [#allocation4], 1 }

</bundles_post_ra>
